<compile_context>
chip_gen: v5e
topology: v5e:2x2
jax: 0.10.0
libtpu: 0.0.40
codegen_flags: <defaults>
</compile_context>

<pallas_src>
import functools

import jax
import jax.numpy as jnp
from jax.experimental import pallas as pl
from jax.experimental.pallas import tpu as pltpu

_BN_EPS = 1e-5


def _double_conv_kernel(x_ref, b1_ref, g1_ref, t1_ref, b2_ref, g2_ref, t2_ref,
                        out_ref, *, H, Cout):
    """All refs in VMEM.

    x_ref   : (N*H, W*Cin)   f32 lane-dense input (one image row per sublane row)
    b*_ref  : (3*L, W*Cout)  bf16 banded conv matrices, vertical taps stacked along K
                             in order [dh=-1, dh=0, dh=+1]
    g*/t*   : (1, W*Cout)    f32 BN gamma / beta tiled over the w lane groups
    out_ref : (N*H, W*Cout)  f32 lane-dense output (128 lanes -> unmasked stores)
    """
    NH = x_ref.shape[0]
    Lout = out_ref.shape[1]
    W = Lout // Cout
    inv_count = 1.0 / float(NH * W)          # 1 / (N*H*W)

    # (NH, 1) h-edge masks, computed once and shared by both convs.  They zero the
    # vertical taps that would otherwise read across the image (h) / batch boundary.
    h_idx = jax.lax.broadcasted_iota(jnp.int32, (NH, 1), 0) % H
    m_top = (h_idx != 0).astype(jnp.float32)      # dh = -1 tap invalid on h == 0
    m_bot = (h_idx != H - 1).astype(jnp.float32)  # dh = +1 tap invalid on h == H-1

    def conv_rows(a, bm_ref):
        # Vertical taps: row-rotations (XLU) + (NH,1) edge masks, lane-concatenated into
        # one (NH, 3*L) slab so the whole 3x3 conv is ONE bf16 MXU matmul (K = 3*L); the
        # horizontal taps + channel contraction live in the band matrix, and the w-border
        # zero padding comes for free from the band structure.
        nrows = a.shape[0]
        a_prev = pltpu.roll(a, 1, 0) * m_top            # row r sees a[r-1]
        a_next = pltpu.roll(a, nrows - 1, 0) * m_bot    # row r sees a[r+1]
        a3 = jnp.concatenate([a_prev, a, a_next], axis=1).astype(jnp.bfloat16)
        return jnp.dot(a3, bm_ref[...], preferred_element_type=jnp.float32)

    def chan_allreduce(v):
        # v: (1, W*Cout). Lane-rotation tree-sum across the W lane groups (stride Cout);
        # afterwards every lane holds its channel's total. Requires W to be a power of 2.
        s, sh = v, Cout
        while sh < Lout:
            s = s + pltpu.roll(s, sh, 1)
            sh *= 2
        return s

    def bn_relu(y, g_lane, t_lane):
        # Single-pass training-mode BatchNorm (sum + sum-of-squares, biased var), applied
        # as a single FMA y*scale + shift; all the per-channel algebra stays on (1,Lout).
        colsum = jnp.sum(y, axis=0, keepdims=True)
        colsumsq = jnp.sum(y * y, axis=0, keepdims=True)
        mean = chan_allreduce(colsum) * inv_count
        var = jnp.maximum(chan_allreduce(colsumsq) * inv_count - mean * mean, 0.0)
        scale = jax.lax.rsqrt(var + _BN_EPS) * g_lane
        shift = t_lane - mean * scale
        return jnp.maximum(y * scale + shift, 0.0)

    h1 = bn_relu(conv_rows(x_ref[...], b1_ref), g1_ref[...], t1_ref[...])
    out_ref[...] = bn_relu(conv_rows(h1, b2_ref), g2_ref[...], t2_ref[...])


def _band_matrices(w_hwio, W):
    """(3, 3, Ci, Co) conv weights -> (3, W*Ci, W*Co) banded matrices (one per dh).

    B_dh[w_in*Ci + ci, w_out*Co + co] = w_hwio[dh, (w_in - w_out) + 1, ci, co] if
    |w_in - w_out| <= 1 else 0, so  out_row = sum_dh a_row(shifted by dh) @ B_dh.
    """
    Ci, Co = w_hwio.shape[2], w_hwio.shape[3]
    w_in = jnp.arange(W)[:, None]
    w_out = jnp.arange(W)[None, :]
    delta = w_in - w_out                                     # (W, W)
    valid = jnp.abs(delta) <= 1
    dw = jnp.clip(delta + 1, 0, 2)
    g = w_hwio[:, dw, :, :]                                  # (3, W, W, Ci, Co)
    g = jnp.where(valid[None, :, :, None, None], g, 0.0)
    g = jnp.transpose(g, (0, 1, 3, 2, 4))                    # (3, W, Ci, W, Co)
    return g.reshape(3, W * Ci, W * Co)


def double_conv(x_nchw, params):
    """x_nchw: (N, Cin, H, W) float32 -> (N, Cout, H, W) float32."""
    N, Cin, H, W = x_nchw.shape
    Cout = params["w1"].shape[-1]
    assert W & (W - 1) == 0, "lane-group BN reduction assumes W is a power of 2"
    NH, Lin, Lout = N * H, W * Cin, W * Cout

    # NCHW -> lane-dense rows. The transpose's producer is allowed to fuse into the
    # pallas_call (allow_input_fusion) so x2d does not have to round-trip HBM.
    # TODO(synk): also keep NHWC at the module boundary to drop the output transpose.
    x2d = jnp.transpose(x_nchw.astype(jnp.float32), (0, 2, 3, 1)).reshape(NH, Lin)

    # Banded conv matrices, vertical taps stacked along K ([dh=-1, 0, +1] to match the
    # in-kernel lane concat), emitted directly in bf16 for the MXU.
    b1m = _band_matrices(params["w1"].astype(jnp.float32), W)
    b1m = b1m.reshape(3 * Lin, Lout).astype(jnp.bfloat16)
    b2m = _band_matrices(params["w2"].astype(jnp.float32), W)
    b2m = b2m.reshape(3 * Lout, Lout).astype(jnp.bfloat16)

    # Conv biases b1/b2 are NOT passed: training-mode BN cancels them exactly.
    lane = lambda v: jnp.tile(v.astype(jnp.float32).reshape(1, Cout), (1, W))
    g1, t1 = lane(params["g1"]), lane(params["bt1"])
    g2, t2 = lane(params["g2"]), lane(params["bt2"])

    vmem = lambda: pl.BlockSpec(memory_space=pltpu.MemorySpace.VMEM)
    out2d = pl.pallas_call(
        functools.partial(_double_conv_kernel, H=H, Cout=Cout),
        out_shape=jax.ShapeDtypeStruct((NH, Lout), jnp.float32),
        in_specs=[vmem() for _ in range(7)],
        out_specs=vmem(),
        compiler_params=pltpu.CompilerParams(
            # let XLA fuse the NCHW->lane-dense transpose into the kernel's input.
            allow_input_fusion=[True, False, False, False, False, False, False],
        ),
    )(x2d, b1m, g1, t1, b2m, g2, t2)

    return jnp.transpose(out2d.reshape(N, H, W, Cout), (0, 3, 1, 2))


def double_conv_reference(x_nchw, params):
    """Pure-JAX reference (matches PyTorch training-mode forward, f32 throughout)."""
    def conv_bn_relu(x, w, b, g, bt):
        y = jax.lax.conv_general_dilated(
            x, w, window_strides=(1, 1), padding="SAME",
            dimension_numbers=("NHWC", "HWIO", "NHWC"),
            precision=jax.lax.Precision.HIGHEST)
        y = y + b[0]
        m = jnp.mean(y, axis=(0, 1, 2), keepdims=True)
        v = jnp.mean((y - m) ** 2, axis=(0, 1, 2), keepdims=True)
        y = (y - m) / jnp.sqrt(v + _BN_EPS) * g[0] + bt[0]
        return jnp.maximum(y, 0.0)

    x = jnp.transpose(x_nchw, (0, 2, 3, 1)).astype(jnp.float32)
    h = conv_bn_relu(x, params["w1"], params["b1"], params["g1"], params["bt1"])
    h = conv_bn_relu(h, params["w2"], params["b2"], params["g2"], params["bt2"])
    return jnp.transpose(h, (0, 3, 1, 2))


if __name__ == "__main__":
    in_ch, out_ch = 4, 8
    N, H, W = 2, 16, 16

    key = jax.random.PRNGKey(0)
    kx, kw1, kb1, kg1, kt1, kw2, kb2, kg2, kt2 = jax.random.split(key, 9)

    x = jax.random.normal(kx, (N, in_ch, H, W), jnp.float32)
    params = dict(
        # conv weights stored HWIO (3, 3, in, out); PyTorch's (out,in,3,3) is a transpose.
        w1=0.1 * jax.random.normal(kw1, (3, 3, in_ch, out_ch), jnp.float32),
        b1=0.1 * jax.random.normal(kb1, (1, out_ch), jnp.float32),
        g1=1.0 + 0.1 * jax.random.normal(kg1, (1, out_ch), jnp.float32),
        bt1=0.1 * jax.random.normal(kt1, (1, out_ch), jnp.float32),
        w2=0.1 * jax.random.normal(kw2, (3, 3, out_ch, out_ch), jnp.float32),
        b2=0.1 * jax.random.normal(kb2, (1, out_ch), jnp.float32),
        g2=1.0 + 0.1 * jax.random.normal(kg2, (1, out_ch), jnp.float32),
        bt2=0.1 * jax.random.normal(kt2, (1, out_ch), jnp.float32),
    )

    y = jax.block_until_ready(jax.jit(double_conv)(x, params))
    y_ref = jax.block_until_ready(double_conv_reference(x, params))

    assert y.shape == (N, out_ch, H, W), y.shape
    # bf16 MXU operands vs. f32 reference: tolerance re-validated (post-BN outputs are
    # ~unit-scale, bf16 rounding through two conv+BN stages stays well under 0.1).
    err = float(jnp.max(jnp.abs(y - y_ref)))
    assert err < 1e-1, f"max abs error vs reference: {err}"
    print("KERNEL_OK")
</pallas_src>

<mosaic_0001>
module attributes {stable_mosaic.version = 11 : i64} {
  func.func @_double_conv_kernel(%arg0: memref<32x64xf32, #tpu.memory_space<vmem>>, %arg1: memref<192x128xbf16, #tpu.memory_space<vmem>>, %arg2: memref<1x128xf32, #tpu.memory_space<vmem>>, %arg3: memref<1x128xf32, #tpu.memory_space<vmem>>, %arg4: memref<384x128xbf16, #tpu.memory_space<vmem>>, %arg5: memref<1x128xf32, #tpu.memory_space<vmem>>, %arg6: memref<1x128xf32, #tpu.memory_space<vmem>>, %arg7: memref<32x128xf32, #tpu.memory_space<vmem>>) attributes {dimension_semantics = [], scalar_prefetch = 0 : i64, scratch_operands = 0 : i64, tpu.core_type = #tpu.core_type<tc>} {
    %0 = tpu.iota {dimensions = array<i32: 0>} : vector<32x1xi32>
    %c16_i32 = arith.constant 16 : i32
    %c0_i32 = arith.constant 0 : i32
    %1 = arith.cmpi eq, %c16_i32, %c0_i32 : i32
    %c1_i32 = arith.constant 1 : i32
    %2 = arith.select %1, %c1_i32, %c16_i32 : i32
    %3 = vector.broadcast %2 : i32 to vector<32x1xi32>
    %4 = arith.remsi %0, %3 : vector<32x1xi32>
    %c0_i32_0 = arith.constant 0 : i32
    %5 = vector.broadcast %c0_i32_0 : i32 to vector<32x1xi32>
    %6 = arith.cmpi ne, %4, %5 : vector<32x1xi32>
    %c0_i32_1 = arith.constant 0 : i32
    %7 = vector.broadcast %c0_i32_1 : i32 to vector<32x1xi32>
    %8 = arith.cmpi slt, %4, %7 : vector<32x1xi32>
    %c0_i32_2 = arith.constant 0 : i32
    %9 = arith.cmpi slt, %2, %c0_i32_2 : i32
    %10 = vector.broadcast %9 : i1 to vector<32x1xi1>
    %11 = vector.broadcast %10 : vector<32x1xi1> to vector<32x1xi1>
    %12 = arith.xori %8, %11 : vector<32x1xi1>
    %13 = arith.andi %12, %6 : vector<32x1xi1>
    %14 = vector.broadcast %2 : i32 to vector<32x1xi32>
    %15 = arith.addi %4, %14 : vector<32x1xi32>
    %16 = arith.select %13, %15, %4 : vector<32x1xi1>, vector<32x1xi32>
    %c0_i32_3 = arith.constant 0 : i32
    %17 = vector.broadcast %c0_i32_3 : i32 to vector<32x1xi32>
    %18 = arith.cmpi ne, %16, %17 : vector<32x1xi32>
    %19 = arith.extui %18 : vector<32x1xi1> to vector<32x1xi32>
    %20 = arith.sitofp %19 : vector<32x1xi32> to vector<32x1xf32>
    %c15_i32 = arith.constant 15 : i32
    %21 = vector.broadcast %c15_i32 : i32 to vector<32x1xi32>
    %22 = arith.cmpi ne, %16, %21 : vector<32x1xi32>
    %23 = arith.extui %22 : vector<32x1xi1> to vector<32x1xi32>
    %24 = arith.sitofp %23 : vector<32x1xi32> to vector<32x1xf32>
    %c0 = arith.constant 0 : index
    %c0_4 = arith.constant 0 : index
    %25 = vector.load %arg0[%c0, %c0_4] : memref<32x64xf32, #tpu.memory_space<vmem>>, vector<32x64xf32>
    %c1_i32_5 = arith.constant 1 : i32
    %26 = tpu.dynamic_rotate %25 by %c1_i32_5 dim 0 : vector<32x64xf32>, i32 -> vector<32x64xf32>
    %27 = vector.broadcast %20 : vector<32x1xf32> to vector<32x64xf32>
    %28 = arith.mulf %26, %27 : vector<32x64xf32>
    %c31_i32 = arith.constant 31 : i32
    %29 = tpu.dynamic_rotate %25 by %c31_i32 dim 0 : vector<32x64xf32>, i32 -> vector<32x64xf32>
    %30 = vector.broadcast %24 : vector<32x1xf32> to vector<32x64xf32>
    %31 = arith.mulf %29, %30 : vector<32x64xf32>
    %32 = tpu.concatenate %28, %25, %31 in 1 : vector<32x64xf32>, vector<32x64xf32>, vector<32x64xf32> -> vector<32x192xf32>
    %33 = arith.truncf %32 : vector<32x192xf32> to vector<32x192xbf16>
    %c0_6 = arith.constant 0 : index
    %c0_7 = arith.constant 0 : index
    %34 = vector.load %arg1[%c0_6, %c0_7] : memref<192x128xbf16, #tpu.memory_space<vmem>>, vector<192x128xbf16>
    %cst = arith.constant dense<0.000000e+00> : vector<32x128xf32>
    %35 = tpu.matmul %33, %34, %cst {dimension_numbers = #tpu.dot_dimension_numbers<[1], [0], [0], [1], [0, 0, 1, 1], [], []>} : vector<32x192xbf16>, vector<192x128xbf16>, vector<32x128xf32> -> vector<32x128xf32>
    %c0_8 = arith.constant 0 : index
    %c0_9 = arith.constant 0 : index
    %36 = vector.load %arg2[%c0_8, %c0_9] : memref<1x128xf32, #tpu.memory_space<vmem>>, vector<1x128xf32>
    %c0_10 = arith.constant 0 : index
    %c0_11 = arith.constant 0 : index
    %37 = vector.load %arg3[%c0_10, %c0_11] : memref<1x128xf32, #tpu.memory_space<vmem>>, vector<1x128xf32>
    %cst_12 = arith.constant dense<0.000000e+00> : vector<128xf32>
    %38 = vector.multi_reduction <add>, %35, %cst_12 [0] : vector<32x128xf32> to vector<128xf32>
    %39 = vector.shape_cast %38 : vector<128xf32> to vector<1x128xf32>
    %40 = arith.mulf %35, %35 : vector<32x128xf32>
    %cst_13 = arith.constant dense<0.000000e+00> : vector<128xf32>
    %41 = vector.multi_reduction <add>, %40, %cst_13 [0] : vector<32x128xf32> to vector<128xf32>
    %42 = vector.shape_cast %41 : vector<128xf32> to vector<1x128xf32>
    %c8_i32 = arith.constant 8 : i32
    %43 = tpu.dynamic_rotate %39 by %c8_i32 dim 1 : vector<1x128xf32>, i32 -> vector<1x128xf32>
    %44 = arith.addf %39, %43 : vector<1x128xf32>
    %c16_i32_14 = arith.constant 16 : i32
    %45 = tpu.dynamic_rotate %44 by %c16_i32_14 dim 1 : vector<1x128xf32>, i32 -> vector<1x128xf32>
    %46 = arith.addf %44, %45 : vector<1x128xf32>
    %c32_i32 = arith.constant 32 : i32
    %47 = tpu.dynamic_rotate %46 by %c32_i32 dim 1 : vector<1x128xf32>, i32 -> vector<1x128xf32>
    %48 = arith.addf %46, %47 : vector<1x128xf32>
    %c64_i32 = arith.constant 64 : i32
    %49 = tpu.dynamic_rotate %48 by %c64_i32 dim 1 : vector<1x128xf32>, i32 -> vector<1x128xf32>
    %50 = arith.addf %48, %49 : vector<1x128xf32>
    %cst_15 = arith.constant 0.001953125 : f32
    %51 = vector.broadcast %cst_15 : f32 to vector<1x128xf32>
    %52 = arith.mulf %50, %51 : vector<1x128xf32>
    %c8_i32_16 = arith.constant 8 : i32
    %53 = tpu.dynamic_rotate %42 by %c8_i32_16 dim 1 : vector<1x128xf32>, i32 -> vector<1x128xf32>
    %54 = arith.addf %42, %53 : vector<1x128xf32>
    %c16_i32_17 = arith.constant 16 : i32
    %55 = tpu.dynamic_rotate %54 by %c16_i32_17 dim 1 : vector<1x128xf32>, i32 -> vector<1x128xf32>
    %56 = arith.addf %54, %55 : vector<1x128xf32>
    %c32_i32_18 = arith.constant 32 : i32
    %57 = tpu.dynamic_rotate %56 by %c32_i32_18 dim 1 : vector<1x128xf32>, i32 -> vector<1x128xf32>
    %58 = arith.addf %56, %57 : vector<1x128xf32>
    %c64_i32_19 = arith.constant 64 : i32
    %59 = tpu.dynamic_rotate %58 by %c64_i32_19 dim 1 : vector<1x128xf32>, i32 -> vector<1x128xf32>
    %60 = arith.addf %58, %59 : vector<1x128xf32>
    %cst_20 = arith.constant 0.001953125 : f32
    %61 = vector.broadcast %cst_20 : f32 to vector<1x128xf32>
    %62 = arith.mulf %60, %61 : vector<1x128xf32>
    %63 = arith.mulf %52, %52 : vector<1x128xf32>
    %64 = arith.subf %62, %63 : vector<1x128xf32>
    %cst_21 = arith.constant 0.000000e+00 : f32
    %65 = vector.broadcast %cst_21 : f32 to vector<1x128xf32>
    %66 = arith.maximumf %64, %65 : vector<1x128xf32>
    %cst_22 = arith.constant 9.99999974E-6 : f32
    %67 = vector.broadcast %cst_22 : f32 to vector<1x128xf32>
    %68 = arith.addf %66, %67 : vector<1x128xf32>
    %69 = math.rsqrt %68 : vector<1x128xf32>
    %70 = arith.mulf %69, %36 : vector<1x128xf32>
    %71 = arith.mulf %52, %70 : vector<1x128xf32>
    %72 = arith.subf %37, %71 : vector<1x128xf32>
    %73 = vector.broadcast %70 : vector<1x128xf32> to vector<32x128xf32>
    %74 = arith.mulf %35, %73 : vector<32x128xf32>
    %75 = vector.broadcast %72 : vector<1x128xf32> to vector<32x128xf32>
    %76 = arith.addf %74, %75 : vector<32x128xf32>
    %cst_23 = arith.constant 0.000000e+00 : f32
    %77 = vector.broadcast %cst_23 : f32 to vector<32x128xf32>
    %78 = arith.maximumf %76, %77 : vector<32x128xf32>
    %c1_i32_24 = arith.constant 1 : i32
    %79 = tpu.dynamic_rotate %78 by %c1_i32_24 dim 0 : vector<32x128xf32>, i32 -> vector<32x128xf32>
    %80 = vector.broadcast %20 : vector<32x1xf32> to vector<32x128xf32>
    %81 = arith.mulf %79, %80 : vector<32x128xf32>
    %c31_i32_25 = arith.constant 31 : i32
    %82 = tpu.dynamic_rotate %78 by %c31_i32_25 dim 0 : vector<32x128xf32>, i32 -> vector<32x128xf32>
    %83 = vector.broadcast %24 : vector<32x1xf32> to vector<32x128xf32>
    %84 = arith.mulf %82, %83 : vector<32x128xf32>
    %85 = tpu.concatenate %81, %78, %84 in 1 : vector<32x128xf32>, vector<32x128xf32>, vector<32x128xf32> -> vector<32x384xf32>
    %86 = arith.truncf %85 : vector<32x384xf32> to vector<32x384xbf16>
    %c0_26 = arith.constant 0 : index
    %c0_27 = arith.constant 0 : index
    %87 = vector.load %arg4[%c0_26, %c0_27] : memref<384x128xbf16, #tpu.memory_space<vmem>>, vector<384x128xbf16>
    %cst_28 = arith.constant dense<0.000000e+00> : vector<32x128xf32>
    %88 = tpu.matmul %86, %87, %cst_28 {dimension_numbers = #tpu.dot_dimension_numbers<[1], [0], [0], [1], [0, 0, 1, 1], [], []>} : vector<32x384xbf16>, vector<384x128xbf16>, vector<32x128xf32> -> vector<32x128xf32>
    %c0_29 = arith.constant 0 : index
    %c0_30 = arith.constant 0 : index
    %89 = vector.load %arg5[%c0_29, %c0_30] : memref<1x128xf32, #tpu.memory_space<vmem>>, vector<1x128xf32>
    %c0_31 = arith.constant 0 : index
    %c0_32 = arith.constant 0 : index
    %90 = vector.load %arg6[%c0_31, %c0_32] : memref<1x128xf32, #tpu.memory_space<vmem>>, vector<1x128xf32>
    %cst_33 = arith.constant dense<0.000000e+00> : vector<128xf32>
    %91 = vector.multi_reduction <add>, %88, %cst_33 [0] : vector<32x128xf32> to vector<128xf32>
    %92 = vector.shape_cast %91 : vector<128xf32> to vector<1x128xf32>
    %93 = arith.mulf %88, %88 : vector<32x128xf32>
    %cst_34 = arith.constant dense<0.000000e+00> : vector<128xf32>
    %94 = vector.multi_reduction <add>, %93, %cst_34 [0] : vector<32x128xf32> to vector<128xf32>
    %95 = vector.shape_cast %94 : vector<128xf32> to vector<1x128xf32>
    %c8_i32_35 = arith.constant 8 : i32
    %96 = tpu.dynamic_rotate %92 by %c8_i32_35 dim 1 : vector<1x128xf32>, i32 -> vector<1x128xf32>
    %97 = arith.addf %92, %96 : vector<1x128xf32>
    %c16_i32_36 = arith.constant 16 : i32
    %98 = tpu.dynamic_rotate %97 by %c16_i32_36 dim 1 : vector<1x128xf32>, i32 -> vector<1x128xf32>
    %99 = arith.addf %97, %98 : vector<1x128xf32>
    %c32_i32_37 = arith.constant 32 : i32
    %100 = tpu.dynamic_rotate %99 by %c32_i32_37 dim 1 : vector<1x128xf32>, i32 -> vector<1x128xf32>
    %101 = arith.addf %99, %100 : vector<1x128xf32>
    %c64_i32_38 = arith.constant 64 : i32
    %102 = tpu.dynamic_rotate %101 by %c64_i32_38 dim 1 : vector<1x128xf32>, i32 -> vector<1x128xf32>
    %103 = arith.addf %101, %102 : vector<1x128xf32>
    %cst_39 = arith.constant 0.001953125 : f32
    %104 = vector.broadcast %cst_39 : f32 to vector<1x128xf32>
    %105 = arith.mulf %103, %104 : vector<1x128xf32>
    %c8_i32_40 = arith.constant 8 : i32
    %106 = tpu.dynamic_rotate %95 by %c8_i32_40 dim 1 : vector<1x128xf32>, i32 -> vector<1x128xf32>
    %107 = arith.addf %95, %106 : vector<1x128xf32>
    %c16_i32_41 = arith.constant 16 : i32
    %108 = tpu.dynamic_rotate %107 by %c16_i32_41 dim 1 : vector<1x128xf32>, i32 -> vector<1x128xf32>
    %109 = arith.addf %107, %108 : vector<1x128xf32>
    %c32_i32_42 = arith.constant 32 : i32
    %110 = tpu.dynamic_rotate %109 by %c32_i32_42 dim 1 : vector<1x128xf32>, i32 -> vector<1x128xf32>
    %111 = arith.addf %109, %110 : vector<1x128xf32>
    %c64_i32_43 = arith.constant 64 : i32
    %112 = tpu.dynamic_rotate %111 by %c64_i32_43 dim 1 : vector<1x128xf32>, i32 -> vector<1x128xf32>
    %113 = arith.addf %111, %112 : vector<1x128xf32>
    %cst_44 = arith.constant 0.001953125 : f32
    %114 = vector.broadcast %cst_44 : f32 to vector<1x128xf32>
    %115 = arith.mulf %113, %114 : vector<1x128xf32>
    %116 = arith.mulf %105, %105 : vector<1x128xf32>
    %117 = arith.subf %115, %116 : vector<1x128xf32>
    %cst_45 = arith.constant 0.000000e+00 : f32
    %118 = vector.broadcast %cst_45 : f32 to vector<1x128xf32>
    %119 = arith.maximumf %117, %118 : vector<1x128xf32>
    %cst_46 = arith.constant 9.99999974E-6 : f32
    %120 = vector.broadcast %cst_46 : f32 to vector<1x128xf32>
    %121 = arith.addf %119, %120 : vector<1x128xf32>
    %122 = math.rsqrt %121 : vector<1x128xf32>
    %123 = arith.mulf %122, %89 : vector<1x128xf32>
    %124 = arith.mulf %105, %123 : vector<1x128xf32>
    %125 = arith.subf %90, %124 : vector<1x128xf32>
    %126 = vector.broadcast %123 : vector<1x128xf32> to vector<32x128xf32>
    %127 = arith.mulf %88, %126 : vector<32x128xf32>
    %128 = vector.broadcast %125 : vector<1x128xf32> to vector<32x128xf32>
    %129 = arith.addf %127, %128 : vector<32x128xf32>
    %cst_47 = arith.constant 0.000000e+00 : f32
    %130 = vector.broadcast %cst_47 : f32 to vector<32x128xf32>
    %131 = arith.maximumf %129, %130 : vector<32x128xf32>
    %c0_48 = arith.constant 0 : index
    %c0_49 = arith.constant 0 : index
    %132 = vector.load %arg7[%c0_48, %c0_49] : memref<32x128xf32, #tpu.memory_space<vmem>>, vector<32x128xf32>
    tpu.vector_store %arg7[%c0_48, %c0_49], %131 {strides = array<i32>} : memref<32x128xf32, #tpu.memory_space<vmem>>, vector<32x128xf32>,
    return
  }
}

</mosaic_0001>

<bundles_post_ra>
// kernel: double_conv.1
= control target key start
LH: loop header
LB: loop body
LE: loop exit
PB: predicated region body
PF: predicated region fallthrough
CT: control target
= control target key end

     0   :  { %v27_v0 = vlaneseq  ;;  %s957_s9 = smov 64   ;;  %v958_v20 = vmov 0.0   ;;  %vm150_vm2 = vcmask 523264   ;;  %s960_s11 = smov 16   ;;  %s1279_s0 = inlined_call_operand.vmem [shape: f32[32,64], index: 0, kind: input, shape index: {}]   ;;  %s1280_s1 = inlined_call_operand.vmem [shape: bf16[192,128], index: 1, kind: input, shape index: {}]   ;;  %s1281_s4 = inlined_call_operand.vmem [shape: bf16[384,128], index: 4, kind: input, shape index: {}]   ;;  %s1282_s2 = inlined_call_operand.vmem [shape: f32[1,128], index: 2, kind: input, shape index: {}]   ;;  %s1283_s3 = inlined_call_operand.vmem [shape: f32[1,128], index: 3, kind: input, shape index: {}]   ;;  %s1284_s5 = inlined_call_operand.vmem [shape: f32[1,128], index: 5, kind: input, shape index: {}]   ;;  %s1285_s6 = inlined_call_operand.vmem [shape: f32[1,128], index: 6, kind: input, shape index: {}]   ;;  %s1286_s7 = inlined_call_operand.vmem [shape: f32[32,128], index: 7, kind: output, shape index: {}]  }
   0x1   :  { %v104_v1 = vld [vmem:[%s1279_s0] sm:$0xff]  ;;  %v1008_v2 = vld [vmem:[%s1279_s0 + $0x8] sm:$0xff]  ;;  %v909_v4 = vld [vmem:[%s1280_s1 + $0x38] sm:$0xff]  ;;  %s961_s12 = smov 32  }
   0x2   :  { %v943_v3 = vpack.i.bf16 %v1008_v2, %v104_v1  ;;  %v913_v5 = vld [vmem:[%s1280_s1 + $0x58] sm:$0xff]  ;;  %v106_v6 = vld [vmem:[%s1279_s0 + $0x10] sm:$0xff]  ;;  %261 = vmatpush.bf16.msra.mxu0 %v909_v4  ;;  %v1024_v8 = vshrl.u32 %v27_v0, 7  ;;  %v122_v9 = vrot.slane %v1008_v2, 1  ;;  %v907_v15 = vld [vmem:[%s1280_s1 + $0x28] sm:$0xff]  ;;  %v121_v17 = vrot.slane %v104_v1, 1 }
   0x3   :  { %v908_v7 = vld [vmem:[%s1280_s1 + $0x30] sm:$0xff]  ;;  %v107_v10 = vld [vmem:[%s1279_s0 + $0x18] sm:$0xff]  ;;  %v123_v11 = vrot.slane %v106_v6, 1  ;;  %284 = vmatpush.bf16.msra.mxu1 %v913_v5  ;;  %v911_v18 = vld [vmem:[%s1280_s1 + $0x48] sm:$0xff]  ;;  %v108_v30 = vrot.slane %v104_v1, 7  ;;  %v109_v32 = vrot.slane %v1008_v2, 7 }
   0x4   :  { %944 = vrot.lane.b32.xlu0 %v943_v3, %s957_s9  ;;  %v912_v12 = vld [vmem:[%s1280_s1 + $0x50] sm:$0xff]  ;;  %v29_v13 = vadd.s32 8, %v1024_v8  ;;  %vm125_vm0 = vcmp.lt.s32.totalorder %v1024_v8, 7  ;;  %v948_v14 = vpack.i.bf16 %v107_v10, %v106_v6  ;;  %v906_v22 = vld [vmem:[%s1280_s1 + $0x20] sm:$0xff]  ;;  %v905_v26 = vld [vmem:[%s1280_s1 + $0x18] sm:$0xff]  ;;  %v111_v31 = vrot.slane %v107_v10, 7 }
   0x5   :  { %v127_v19 = vsel %vm125_vm0, %v122_v9, %v123_v11  ;;  %v910_v24 = vld [vmem:[%s1280_s1 + $0x40] sm:$0xff]  ;;  %v128_v25 = vsel %vm125_vm0, %v121_v17, %v122_v9  ;;  %v904_v28 = vld [vmem:[%s1280_s1 + $0x10] sm:$0xff]  ;;  %v903_v29 = vld [vmem:[%s1280_s1 + $0x8] sm:$0xff]  ;;  %vm112_vm3 = vcmp.lt.s32.totalorder %v1024_v8, 1  ;;  %v124_v36 = vrot.slane %v107_v10, 1 }
   0x6   :  { %262 = vmatpush.bf16.msra.mxu0 %v908_v7  ;;  %v43_v16 = vand.u32 15, %v29_v13  ;;  %v116_v33 = vsel %vm112_vm3, %v111_v31, %v108_v30  ;;  %v902_v34 = vld [vmem:[%s1280_s1] sm:$0xff]  ;;  %v115_v35 = vsel %vm112_vm3, %v108_v30, %v109_v32  ;;  %v31_v37 = vadd.s32 24, %v1024_v8  ;;  %s959_s1 = smov 8  }
   0x7   :  { %285 = vmatpush.bf16.msra.mxu1 %v912_v12  ;;  %v110_v38 = vrot.slane %v106_v6, 7  ;;  %v129_v40 = vsel %vm125_vm0, %v124_v36, %v121_v17  ;;  %v126_v42 = vsel %vm125_vm0, %v123_v11, %v124_v36  ;;  %v36_v47 = vand.u32 15, %v1024_v8 }
   0x8   :  { %vm93_vm1 = vcmp.ne.s32.totalorder %v43_v16, 15  ;;  %v57_v39 = vand.u32 15, %v31_v37  ;;  %v30_v48 = vadd.s32 16, %v1024_v8 }
   0x9   :  { %v1043_v21 = vsel %vm93_vm1, 1.0, %v958_v20  ;;  %v113_v43 = vsel %vm112_vm3, %v110_v38, %v111_v31  ;;  %v114_v44 = vsel %vm112_vm3, %v109_v32, %v110_v38  ;;  %vm80_vm5 = vcmp.ne.s32.totalorder %v36_v47, 0 }
   0xa   :  { %263 = vmatpush.bf16.msra.mxu0 %v907_v15  ;;  %v131_v23 = vmul.f32 %v1043_v21, %v127_v19  ;;  %vm95_vm4 = vcmp.ne.s32.totalorder %v57_v39, 15  ;;  %v1089_v49 = vsel %vm80_vm5, 1.0, %v958_v20  ;;  %v50_v50 = vand.u32 15, %v30_v48 }
   0xb   :  { %286 = vmatpush.bf16.msra.mxu1 %v911_v18  ;;  %v1077_v41 = vsel %vm95_vm4, 1.0, %v958_v20  ;;  %v117_v51 = vmul.f32 %v1089_v49, %v116_v33 }
   0xc   :  { %949 = vrot.lane.b32.xlu0 %v948_v14, %s957_s9  ;;  %v156_v27 = vpack.c.bf16 %v131_v23, %v128_v25  ;;  %v133_v45 = vmul.f32 %v1077_v41, %v129_v40  ;;  %vm82_vm6 = vcmp.ne.s32.totalorder %v50_v50, 0 }
   0xd   :  { %v1094_v58 = vsel %vm82_vm6, 1.0, %v958_v20 }
   0xe   :  { %264 = vmatpush.bf16.msra.mxu0 %v906_v22  ;;  %v158_v46 = vpack.c.bf16 %v133_v45, %v126_v42  ;;  %v119_v59 = vmul.f32 %v1094_v58, %v114_v44 }
   0xf   :  { %287 = vmatpush.bf16.msra.mxu1 %v910_v24 }
  0x12   :  { %265 = vmatpush.bf16.msra.mxu0 %v905_v26  ;;  %804 = vmatmul.msk.bf16.vlgmr.msra.gmra.mxu1 %vm150_vm2, %v156_v27 }
  0x16   :  { %266 = vmatpush.bf16.msra.mxu0 %v904_v28 }
  0x1a   :  { %267 = vmatpush.bf16.msra.mxu0 %v903_v29 }
  0x1e   :  { %268 = vmatpush.bf16.msra.mxu0 %v902_v34 }
  0x22   :  { %805 = vmatmul.msk.bf16.gmra.mxu1 %vm150_vm2, %v158_v46 }
  0x76   :  { %v945_v52 = vpop.permute.xlu0 %944 }
  0x77   :  { %v947_v53 = vunpack.i.h.bf16 %v945_v52  ;;  %v946_v54 = vunpack.i.l.bf16 %v945_v52  ;;  %v929_v52 = vld [vmem:[%s1281_s4 + $0x78] sm:$0xff] }
  0x78   :  { %623 = vmatpush.bf16.msra.mxu3 %v929_v52 }
  0x79   :  { %v151_v55 = vsel %vm150_vm2, %v117_v51, %v946_v54  ;;  %v152_v56 = vsel %vm150_vm2, %v115_v35, %v947_v53  ;;  %v928_v53 = vld [vmem:[%s1281_s4 + $0x70] sm:$0xff]  ;;  %v921_v54 = vld [vmem:[%s1281_s4 + $0x38] sm:$0xff] }
  0x7a   :  { %v155_v57 = vpack.c.bf16 %v152_v56, %v151_v55  ;;  %v937_v55 = vld [vmem:[%s1281_s4 + $0xb8] sm:$0xff]  ;;  %604 = vmatpush.bf16.msra.mxu2 %v921_v54  ;;  %v927_v56 = vld [vmem:[%s1281_s4 + $0x68] sm:$0xff] }
  0x7b   :  { %642 = vmatpush.bf16.msrb.mxu1 %v937_v55 }
  0x7c   :  { %269 = vmatmul.bf16.vlgmr.msra.gmra.mxu0 %v155_v57  ;;  %624 = vmatpush.bf16.msra.mxu3 %v928_v53  ;;  %v920_v57 = vld [vmem:[%s1281_s4 + $0x30] sm:$0xff] }
  0x7e   :  { %v950_v60 = vpop.permute.xlu0 %949  ;;  %605 = vmatpush.bf16.msra.mxu2 %v920_v57 }
  0x7f   :  { %v952_v61 = vunpack.i.h.bf16 %v950_v60  ;;  %v951_v62 = vunpack.i.l.bf16 %v950_v60  ;;  %v926_v60 = vld [vmem:[%s1281_s4 + $0x60] sm:$0xff] }
  0x80   :  { %625 = vmatpush.bf16.msra.mxu3 %v927_v56 }
  0x81   :  { %v153_v63 = vsel %vm150_vm2, %v119_v59, %v951_v62  ;;  %v154_v0 = vsel %vm150_vm2, %v113_v43, %v952_v61  ;;  %v936_v59 = vld [vmem:[%s1281_s4 + $0xb0] sm:$0xff]  ;;  %v919_v61 = vld [vmem:[%s1281_s4 + $0x28] sm:$0xff] }
  0x82   :  { %v157_v1 = vpack.c.bf16 %v154_v0, %v153_v63  ;;  %643 = vmatpush.bf16.msrb.mxu1 %v936_v59  ;;  %v935_v62 = vld [vmem:[%s1281_s4 + $0xa8] sm:$0xff]  ;;  %606 = vmatpush.bf16.msra.mxu2 %v919_v61  ;;  %v925_v0 = vld [vmem:[%s1281_s4 + $0x58] sm:$0xff] }
  0x84   :  { %626 = vmatpush.bf16.msra.mxu3 %v926_v60 }
  0x86   :  { %644 = vmatpush.bf16.msrb.mxu1 %v935_v62 }
  0x88   :  { %627 = vmatpush.bf16.msra.mxu3 %v925_v0 }
  0x8c   :  { %274 = vmatmul.bf16.gmra.mxu0 %v157_v1 }
  0x8f   :  { %v289_v2 = vpop.f32.mrf.mxu1 }
  0x97   :  { %v291_v4 = vpop.f32.mrf.mxu1 }
  0x9f   :  { %v294_v6 = vpop.f32.mrf.mxu1 }
  0xa7   :  { %v296_v16 = vpop.f32.mrf.mxu1 }
  0xf9   :  { %v270_v3 = vpop.f32.mrf.mxu0 }
  0xfa   :  { %v1101_v10 = vadd.f32 %v289_v2, %v270_v3  ;;  %v918_v2 = vld [vmem:[%s1281_s4 + $0x20] sm:$0xff] }
  0xfb   :  { %v934_v3 = vld [vmem:[%s1281_s4 + $0xa0] sm:$0xff]  ;;  %607 = vmatpush.bf16.msra.mxu2 %v918_v2 }
  0xfc   :  { %v310_v13 = vmul.f32 %v1101_v10, %v1101_v10  ;;  %645 = vmatpush.bf16.msrb.mxu1 %v934_v3 }
 0x101   :  { %v272_v5 = vpop.f32.mrf.mxu0 }
 0x102   :  { %v1099_v9 = vadd.f32 %v291_v4, %v272_v5  ;;  %v924_v4 = vld [vmem:[%s1281_s4 + $0x50] sm:$0xff] }
 0x103   :  { %628 = vmatpush.bf16.msra.mxu3 %v924_v4 }
 0x104   :  { %v311_v12 = vmul.f32 %v1099_v9, %v1099_v9  ;;  %v301_v14 = vadd.f32 %v1099_v9, %v1101_v10 }
 0x106   :  { %v314_v18 = vadd.f32 %v311_v12, %v310_v13  ;;  %v923_v13 = vld [vmem:[%s1281_s4 + $0x48] sm:$0xff] }
 0x107   :  { %629 = vmatpush.bf16.msra.mxu3 %v923_v13 }
 0x109   :  { %v275_v7 = vpop.f32.mrf.mxu0 }
 0x10a   :  { %v1103_v11 = vadd.f32 %v294_v6, %v275_v7  ;;  %v917_v6 = vld [vmem:[%s1281_s4 + $0x18] sm:$0xff] }
 0x10b   :  { %v933_v7 = vld [vmem:[%s1281_s4 + $0x98] sm:$0xff]  ;;  %608 = vmatpush.bf16.msra.mxu2 %v917_v6 }
 0x10c   :  { %v312_v15 = vmul.f32 %v1103_v11, %v1103_v11  ;;  %v302_v19 = vadd.f32 %v301_v14, %v1103_v11  ;;  %646 = vmatpush.bf16.msrb.mxu1 %v933_v7 }
 0x10e   :  { %v315_v22 = vadd.f32 %v314_v18, %v312_v15  ;;  %v916_v15 = vld [vmem:[%s1281_s4 + $0x10] sm:$0xff] }
 0x10f   :  { %609 = vmatpush.bf16.msra.mxu2 %v916_v15 }
 0x111   :  { %v277_v17 = vpop.f32.mrf.mxu0 }
 0x112   :  { %v1114_v20 = vadd.f32 %v296_v16, %v277_v17  ;;  %v932_v16 = vld [vmem:[%s1281_s4 + $0x90] sm:$0xff] }
 0x113   :  { %647 = vmatpush.bf16.msrb.mxu1 %v932_v16 }
 0x114   :  { %v303_v23 = vadd.f32 %v302_v19, %v1114_v20  ;;  %v313_v24 = vmul.f32 %v1114_v20, %v1114_v20  ;;  %v922_v19 = vld [vmem:[%s1281_s4 + $0x40] sm:$0xff] }
 0x115   :  { %630 = vmatpush.bf16.msra.mxu3 %v922_v19 }
 0x116   :  { %v304_v25 = vrot.slane %v303_v23, 4  ;;  %v316_v26 = vadd.f32 %v315_v22, %v313_v24  ;;  %v931_v24 = vld [vmem:[%s1281_s4 + $0x88] sm:$0xff] }
 0x117   :  { %648 = vmatpush.bf16.msrb.mxu1 %v931_v24 }
 0x118   :  { %v317_v27 = vrot.slane %v316_v26, 4  ;;  %v305_v28 = vadd.f32 %v304_v25, %v303_v23  ;;  %v915_v23 = vld [vmem:[%s1281_s4 + $0x8] sm:$0xff] }
 0x119   :  { %610 = vmatpush.bf16.msra.mxu2 %v915_v23 }
 0x11a   :  { %v306_v29 = vrot.slane %v305_v28, 2  ;;  %v318_v30 = vadd.f32 %v317_v27, %v316_v26  ;;  %v914_v27 = vld [vmem:[%s1281_s4] sm:$0xff] }
 0x11c   :  { %v307_v31 = vadd.f32 %v306_v29, %v305_v28  ;;  %v319_v32 = vrot.slane %v318_v30, 2  ;;  %v930_v28 = vld [vmem:[%s1281_s4 + $0x80] sm:$0xff] }
 0x11d   :  { %611 = vmatpush.bf16.msra.mxu2 %v914_v27  ;;  %649 = vmatpush.bf16.msrb.mxu1 %v930_v28 }
 0x11e   :  { %v308_v33 = vrot.slane %v307_v31, 1  ;;  %v320_v35 = vadd.f32 %v319_v32, %v318_v30 }
 0x120   :  { %v309_v34 = vadd.f32 %v308_v33, %v307_v31  ;;  %v321_v36 = vrot.slane %v320_v35, 1 }
 0x122   :  { %323 = vrot.lane.b32.xlu1 %v309_v34, %s959_s1  ;;  %v322_v37 = vadd.f32 %v321_v36, %v320_v35 }
 0x12a   :  { %336 = vrot.lane.b32.xlu1 %v322_v37, %s959_s1 }
 0x194   :  { %v324_v38 = vpop.permute.xlu1 %323 }
 0x195   :  { %v325_v39 = vadd.f32 %v324_v38, %v309_v34  ;;  %v299_v34 = vld [vmem:[%s1282_s2] sm:$0x1] }
 0x196   :  { %v300_v38 = vld [vmem:[%s1283_s3] sm:$0x1] }
 0x197   :  { %326 = vrot.lane.b32.xlu2 %v325_v39, %s960_s11 }
 0x19c   :  { %v337_v40 = vpop.permute.xlu1 %336 }
 0x19d   :  { %v338_v42 = vadd.f32 %v337_v40, %v322_v37 }
 0x19f   :  { %339 = vrot.lane.b32.xlu2 %v338_v42, %s960_s11 }
 0x1f1   :  { %v327_v43 = vpop.permute.xlu2 %326 }
 0x1f2   :  { %v328_v44 = vadd.f32 %v327_v43, %v325_v39 }
 0x1f4   :  { %329 = vrot.lane.b32.xlu0 %v328_v44, %s961_s12 }
 0x1f9   :  { %v340_v45 = vpop.permute.xlu2 %339 }
 0x1fa   :  { %v341_v46 = vadd.f32 %v340_v45, %v338_v42 }
 0x1fc   :  { %342 = vrot.lane.b32.xlu1 %v341_v46, %s961_s12 }
 0x266   :  { %v330_v47 = vpop.permute.xlu0 %329 }
 0x267   :  { %v331_v48 = vadd.f32 %v330_v47, %v328_v44 }
 0x269   :  { %332 = vrot.lane.b32.xlu2 %v331_v48, %s957_s9 }
 0x26e   :  { %v343_v50 = vpop.permute.xlu1 %342 }
 0x26f   :  { %v344_v51 = vadd.f32 %v343_v50, %v341_v46 }
 0x271   :  { %345 = vrot.lane.b32.xlu0 %v344_v51, %s957_s9 }
 0x2c3   :  { %v333_v63 = vpop.permute.xlu2 %332 }
 0x2c4   :  { %v334_v1 = vadd.f32 %v333_v63, %v331_v48 }
 0x2c6   :  { %v335_v5 = vmul.f32 0.001953125, %v334_v1 }
 0x2c8   :  { %v349_v17 = vmul.f32 %v335_v5, %v335_v5 }
 0x2e3   :  { %v346_v12 = vpop.permute.xlu0 %345 }
 0x2e4   :  { %v347_v14 = vadd.f32 %v346_v12, %v344_v51 }
 0x2e6   :  { %v348_v18 = vmul.f32 0.001953125, %v347_v14 }
 0x2e8   :  { %v350_v22 = vsub.f32 %v348_v18, %v349_v17 }
 0x2ea   :  { %v351_v25 = vmax.f32 %v350_v22, 0.0 }
 0x2ec   :  { %v352_v26 = vadd.f32 1e-05, %v351_v25 }
 0x2ee   :  { %953 = vrsqrt.f32 %v352_v26  ;;  %vm359_vm8 = vweird.f32 %v352_v26 }
 0x2f4   :  { %v954_v29 = vpop.eup %953 }
 0x2f5   :  { %v354_v30 = vmul.f32 %v954_v29, %v352_v26  ;;  %vm360_vm7 = vweird.f32 %v954_v29 }
 0x2f6   :  { %vm361_vm9 = vmor %vm359_vm8, %vm360_vm7 }
 0x2f7   :  { %v355_v31 = vmul.f32 %v954_v29, %v354_v30 }
 0x2f9   :  { %v356_v32 = vmul.f32 0.5, %v355_v31 }
 0x2fb   :  { %v357_v33 = vsub.f32 1.5, %v356_v32 }
 0x2fd   :  { %v358_v35 = vmul.f32 %v954_v29, %v357_v33 }
 0x2ff   :  { %v362_v36 = vsel %vm361_vm9, %v954_v29, %v358_v35 }
 0x300   :  { %v363_v37 = vmul.f32 %v362_v36, %v299_v34 }
 0x302   :  { %v364_v39 = vmul.f32 %v363_v37, %v335_v5  ;;  %v366_v40 = vperm.slane %v363_v37, 0 }
 0x304   :  { %v365_v42 = vsub.f32 %v300_v38, %v364_v39  ;;  %v367_v43 = vmul.f32 %v366_v40, %v1101_v10  ;;  %v368_v44 = vmul.f32 %v366_v40, %v1099_v9  ;;  %v370_v46 = vmul.f32 %v366_v40, %v1114_v20 }
 0x305   :  { %v369_v47 = vmul.f32 %v366_v40, %v1103_v11 }
 0x306   :  { %v372_v45 = vperm.slane %v365_v42, 0 }
 0x308   :  { %v374_v48 = vadd.f32 %v372_v45, %v367_v43  ;;  %v375_v50 = vadd.f32 %v372_v45, %v368_v44  ;;  %v377_v51 = vadd.f32 %v372_v45, %v370_v46  ;;  %v376_v52 = vadd.f32 %v372_v45, %v369_v47 }
 0x30a   :  { %v378_v53 = vmax.f32 %v374_v48, 0.0  ;;  %v379_v54 = vmax.f32 %v375_v50, 0.0  ;;  %v381_v55 = vmax.f32 %v377_v51, 0.0  ;;  %v380_v56 = vmax.f32 %v376_v52, 0.0 }
 0x30c   :  { %v407_v57 = vpack.c.bf16 %v379_v54, %v378_v53  ;;  %v382_v59 = vrot.slane %v378_v53, 7  ;;  %v383_v60 = vrot.slane %v379_v54, 7  ;;  %v385_v61 = vrot.slane %v381_v55, 7 }
 0x30d   :  { %v394_v10 = vrot.slane %v378_v53, 1  ;;  %v395_v62 = vrot.slane %v379_v54, 1  ;;  %v396_v9 = vrot.slane %v380_v56, 1  ;;  %v384_v5 = vrot.slane %v380_v56, 7 }
 0x30e   :  { %631 = vmatmul.bf16.vlgmr.msra.gmra.mxu3 %v407_v57  ;;  %v389_v20 = vsel %vm112_vm3, %v385_v61, %v382_v59  ;;  %v388_v0 = vsel %vm112_vm3, %v382_v59, %v383_v60  ;;  %v397_v6 = vrot.slane %v381_v55, 1  ;;  %v410_v12 = vpack.c.bf16 %v381_v55, %v380_v56 }
 0x30f   :  { %v390_v11 = vmul.f32 %v1089_v49, %v389_v20  ;;  %v399_v63 = vsel %vm125_vm0, %v395_v62, %v396_v9  ;;  %v400_v3 = vsel %vm125_vm0, %v394_v10, %v395_v62  ;;  %v387_v49 = vsel %vm112_vm3, %v383_v60, %v384_v5 }
 0x310   :  { %v403_v1 = vmul.f32 %v1043_v21, %v399_v63  ;;  %v401_v7 = vsel %vm125_vm0, %v397_v6, %v394_v10  ;;  %v392_v13 = vmul.f32 %v1094_v58, %v387_v49  ;;  %v386_v14 = vsel %vm112_vm3, %v384_v5, %v385_v61 }
 0x311   :  { %v406_v2 = vpack.c.bf16 %v388_v0, %v390_v11  ;;  %v405_v21 = vmul.f32 %v1077_v41, %v401_v7  ;;  %v398_v16 = vsel %vm125_vm0, %v396_v9, %v397_v6 }
 0x312   :  { %v408_v4 = vpack.c.bf16 %v403_v1, %v400_v3  ;;  %v409_v15 = vpack.c.bf16 %v386_v14, %v392_v13 }
 0x313   :  { %612 = vmatmul.bf16.vlgmr.msra.gmra.mxu2 %v406_v2  ;;  %v411_v17 = vpack.c.bf16 %v405_v21, %v398_v16 }
 0x314   :  { %650 = vmatmul.bf16.vlgmr.msrb.gmra.mxu1 %v408_v4 }
 0x31e   :  { %636 = vmatmul.bf16.gmra.mxu3 %v410_v12 }
 0x323   :  { %617 = vmatmul.bf16.gmra.mxu2 %v409_v15 }
 0x324   :  { %655 = vmatmul.bf16.gmra.mxu1 %v411_v17 }
 0x391   :  { %v632_v18 = vpop.f32.mrf.mxu3  ;;  %v651_v19 = vpop.f32.mrf.mxu1 }
 0x396   :  { %v613_v22 = vpop.f32.mrf.mxu2 }
 0x397   :  { %v633_v28 = vadd.f32 %v632_v18, %v613_v22 }
 0x399   :  { %v634_v23 = vpop.f32.mrf.mxu3  ;;  %v653_v24 = vpop.f32.mrf.mxu1  ;;  %v1231_v31 = vadd.f32 %v651_v19, %v633_v28 }
 0x39b   :  { %v672_v35 = vmul.f32 %v1231_v31, %v1231_v31 }
 0x39e   :  { %v615_v25 = vpop.f32.mrf.mxu2 }
 0x39f   :  { %v635_v26 = vadd.f32 %v634_v23, %v615_v25  ;;  %v661_v25 = vld [vmem:[%s1284_s5] sm:$0x1] }
 0x3a1   :  { %v637_v58 = vpop.f32.mrf.mxu3  ;;  %v656_v27 = vpop.f32.mrf.mxu1  ;;  %v1229_v30 = vadd.f32 %v653_v24, %v635_v26 }
 0x3a3   :  { %v673_v32 = vmul.f32 %v1229_v30, %v1229_v30  ;;  %v663_v36 = vadd.f32 %v1229_v30, %v1231_v31 }
 0x3a5   :  { %v676_v40 = vadd.f32 %v673_v32, %v672_v35 }
 0x3a6   :  { %v618_v41 = vpop.f32.mrf.mxu2 }
 0x3a7   :  { %v638_v29 = vadd.f32 %v637_v58, %v618_v41  ;;  %v662_v41 = vld [vmem:[%s1285_s6] sm:$0x1] }
 0x3a9   :  { %v1233_v8 = vadd.f32 %v656_v27, %v638_v29  ;;  %v639_v33 = vpop.f32.mrf.mxu3  ;;  %v658_v39 = vpop.f32.mrf.mxu1 }
 0x3ab   :  { %v674_v37 = vmul.f32 %v1233_v8, %v1233_v8  ;;  %v664_v42 = vadd.f32 %v663_v36, %v1233_v8 }
 0x3ad   :  { %v677_v44 = vadd.f32 %v676_v40, %v674_v37 }
 0x3ae   :  { %v620_v34 = vpop.f32.mrf.mxu2 }
 0x3af   :  { %v640_v38 = vadd.f32 %v639_v33, %v620_v34 }
 0x3b1   :  { %v1244_v43 = vadd.f32 %v658_v39, %v640_v38 }
 0x3b3   :  { %v665_v45 = vadd.f32 %v664_v42, %v1244_v43  ;;  %v675_v46 = vmul.f32 %v1244_v43, %v1244_v43 }
 0x3b5   :  { %v666_v47 = vrot.slane %v665_v45, 4  ;;  %v678_v48 = vadd.f32 %v677_v44, %v675_v46 }
 0x3b7   :  { %v667_v50 = vadd.f32 %v666_v47, %v665_v45  ;;  %v679_v51 = vrot.slane %v678_v48, 4 }
 0x3b9   :  { %v668_v52 = vrot.slane %v667_v50, 2  ;;  %v680_v53 = vadd.f32 %v679_v51, %v678_v48 }
 0x3bb   :  { %v669_v54 = vadd.f32 %v668_v52, %v667_v50  ;;  %v681_v55 = vrot.slane %v680_v53, 2 }
 0x3bd   :  { %v670_v56 = vrot.slane %v669_v54, 1  ;;  %v682_v57 = vadd.f32 %v681_v55, %v680_v53 }
 0x3bf   :  { %v671_v59 = vadd.f32 %v670_v56, %v669_v54  ;;  %v683_v60 = vrot.slane %v682_v57, 1 }
 0x3c1   :  { %685 = vrot.lane.b32.xlu1 %v671_v59, %s959_s1  ;;  %v684_v61 = vadd.f32 %v683_v60, %v682_v57 }
 0x3c3   :  { %698 = vrot.lane.b32.xlu2 %v684_v61, %s959_s1 }
 0x41d   :  { %v699_v10 = vpop.permute.xlu2 %698 }
 0x41e   :  { %v700_v62 = vadd.f32 %v699_v10, %v684_v61 }
 0x420   :  { %701 = vrot.lane.b32.xlu1 %v700_v62, %s960_s11 }
 0x433   :  { %v686_v9 = vpop.permute.xlu1 %685 }
 0x434   :  { %v687_v20 = vadd.f32 %v686_v9, %v671_v59 }
 0x436   :  { %688 = vrot.lane.b32.xlu0 %v687_v20, %s960_s11 }
 0x492   :  { %v702_v11 = vpop.permute.xlu1 %701 }
 0x493   :  { %v703_v63 = vadd.f32 %v702_v11, %v700_v62 }
 0x495   :  { %704 = vrot.lane.b32.xlu0 %v703_v63, %s961_s12 }
 0x4a8   :  { %v689_v0 = vpop.permute.xlu0 %688 }
 0x4a9   :  { %v690_v1 = vadd.f32 %v689_v0, %v687_v20 }
 0x4ab   :  { %691 = vrot.lane.b32.xlu2 %v690_v1, %s961_s12 }
 0x505   :  { %v692_v2 = vpop.permute.xlu2 %691 }
 0x506   :  { %v693_v3 = vadd.f32 %v692_v2, %v690_v1 }
 0x507   :  { %v705_v4 = vpop.permute.xlu0 %704 }
 0x508   :  { %v706_v5 = vadd.f32 %v705_v4, %v703_v63  ;;  %694 = vrot.lane.b32.xlu1 %v693_v3, %s957_s9 }
 0x50a   :  { %707 = vrot.lane.b32.xlu2 %v706_v5, %s957_s9 }
 0x564   :  { %v708_v6 = vpop.permute.xlu2 %707 }
 0x565   :  { %v709_v7 = vadd.f32 %v708_v6, %v706_v5 }
 0x567   :  { %v710_v21 = vmul.f32 0.001953125, %v709_v7 }
 0x57a   :  { %v695_v49 = vpop.permute.xlu1 %694 }
 0x57b   :  { %v696_v12 = vadd.f32 %v695_v49, %v693_v3 }
 0x57d   :  { %v697_v13 = vmul.f32 0.001953125, %v696_v12 }
 0x57f   :  { %v711_v14 = vmul.f32 %v697_v13, %v697_v13 }
 0x581   :  { %v712_v15 = vsub.f32 %v710_v21, %v711_v14 }
 0x583   :  { %v713_v16 = vmax.f32 %v712_v15, 0.0 }
 0x585   :  { %v714_v17 = vadd.f32 1e-05, %v713_v16 }
 0x587   :  { %955 = vrsqrt.f32 %v714_v17  ;;  %vm721_vm11 = vweird.f32 %v714_v17 }
 0x58d   :  { %v956_v18 = vpop.eup %955 }
 0x58e   :  { %v716_v19 = vmul.f32 %v956_v18, %v714_v17  ;;  %vm722_vm10 = vweird.f32 %v956_v18 }
 0x58f   :  { %vm723_vm12 = vmor %vm721_vm11, %vm722_vm10 }
 0x590   :  { %v717_v22 = vmul.f32 %v956_v18, %v716_v19 }
 0x592   :  { %v718_v23 = vmul.f32 0.5, %v717_v22 }
 0x594   :  { %v719_v24 = vsub.f32 1.5, %v718_v23 }
 0x596   :  { %v720_v58 = vmul.f32 %v956_v18, %v719_v24 }
 0x598   :  { %v724_v26 = vsel %vm723_vm12, %v956_v18, %v720_v58 }
 0x599   :  { %v725_v27 = vmul.f32 %v724_v26, %v661_v25 }
 0x59b   :  { %v726_v28 = vmul.f32 %v725_v27, %v697_v13  ;;  %v728_v29 = vperm.slane %v725_v27, 0 }
 0x59d   :  { %v727_v32 = vsub.f32 %v662_v41, %v726_v28  ;;  %v729_v33 = vmul.f32 %v728_v29, %v1231_v31  ;;  %v730_v34 = vmul.f32 %v728_v29, %v1229_v30  ;;  %v731_v35 = vmul.f32 %v728_v29, %v1233_v8 }
 0x59e   :  { %v732_v36 = vmul.f32 %v728_v29, %v1244_v43 }
 0x59f   :  { %v734_v37 = vperm.slane %v727_v32, 0 }
 0x5a1   :  { %v736_v38 = vadd.f32 %v734_v37, %v729_v33  ;;  %v737_v39 = vadd.f32 %v734_v37, %v730_v34  ;;  %v738_v40 = vadd.f32 %v734_v37, %v731_v35  ;;  %v739_v42 = vadd.f32 %v734_v37, %v732_v36 }
 0x5a3   :  { %v740_v44 = vmax.f32 %v736_v38, 0.0  ;;  %v741_v45 = vmax.f32 %v737_v39, 0.0  ;;  %v742_v46 = vmax.f32 %v738_v40, 0.0  ;;  %v743_v47 = vmax.f32 %v739_v42, 0.0 }
 0x5a5   :  { %744 = vst [vmem:[%s1286_s7] sm:$0xff] %v740_v44 }
 0x5a6   :  { %745 = vst [vmem:[%s1286_s7 + $0x8] sm:$0xff] %v741_v45 }
 0x5a7   :  { %746 = vst [vmem:[%s1286_s7 + $0x10] sm:$0xff] %v742_v46 }
 0x5a8   :  { %747 = vst [vmem:[%s1286_s7 + $0x18] sm:$0xff] %v743_v47 }

</bundles_post_ra>
